<compile_context>
chip_gen: v6e
topology: v6e:2x2x1
jax: 0.10.0
libtpu: 0.0.40
codegen_flags: <defaults>
</compile_context>

<pallas_src>
import functools

import jax
import jax.numpy as jnp
from jax.experimental import pallas as pl
from jax.experimental.pallas import tpu as pltpu


def _round_up(x, m):
    return ((x + m - 1) // m) * m


def _use_bf16_elementwise():
    """bf16 bias/ReLU only where the VALU has native bf16 (v6e / v7x)."""
    try:
        kind = jax.devices()[0].device_kind.lower()
    except Exception:
        return False
    return ("v6" in kind) or ("v7" in kind)


def autoencoder_kernel(x_ref, w1_ref, wmid_ref, w6_ref, bstk_ref, b6_ref, out_ref,
                       *, elementwise_bf16):
    """x_ref: (tile_b, F_pad) bf16.
    w1_ref: (F_pad, 128) bf16, wmid_ref: (4, 128, 128) bf16, w6_ref: (128, F_pad) bf16.
    bstk_ref: (8, 128) f32 (rows 0..4 = biases of layers 1..5), b6_ref: (1, F_pad) f32.
    out_ref: (tile_b, F_pad) f32."""

    def relu_layer(a, w, b_row):
        # bf16 operands into the MXU, f32 accumulate.
        z = jnp.dot(a.astype(jnp.bfloat16), w, preferred_element_type=jnp.float32)
        if elementwise_bf16:
            # v6e/v7x: bias-add + ReLU on the bf16 VALU; output stays bf16 for the
            # next matmul (no extra cast).
            z = z.astype(jnp.bfloat16) + b_row.astype(jnp.bfloat16)
        else:
            # v5e: no bf16 VALU -> keep elementwise math in f32.
            z = z + b_row
        return jnp.maximum(z, 0.0)

    def sigmoid_layer(a, w, b_row):
        z = jnp.dot(a.astype(jnp.bfloat16), w, preferred_element_type=jnp.float32)
        return jax.nn.sigmoid(z + b_row)

    x = x_ref[...]                                   # already bf16
    # encoder
    a = relu_layer(x, w1_ref[...], bstk_ref[0:1, :])
    a = relu_layer(a, wmid_ref[0], bstk_ref[1:2, :])
    code = sigmoid_layer(a, wmid_ref[1], bstk_ref[2:3, :])
    # decoder
    a = relu_layer(code, wmid_ref[2], bstk_ref[3:4, :])
    a = relu_layer(a, wmid_ref[3], bstk_ref[4:5, :])
    out_ref[...] = sigmoid_layer(a, w6_ref[...], b6_ref[...]).astype(out_ref.dtype)


def _choose_tiling(B, max_tile=2048):
    """Pad B only to a multiple of 8, then split into near-equal tiles.
    Guarantees <8 wasted rows per tile and >=2 grid steps for large batches
    (so v7x megacore gets both TensorCores busy)."""
    B8 = _round_up(max(B, 1), 8)
    if B8 >= 1024:
        n_tiles = max(2, pl.cdiv(B8, max_tile))
    else:
        n_tiles = 1
    tile_b = _round_up(pl.cdiv(B8, n_tiles), 8)
    return tile_b, tile_b * n_tiles


def autoencoder_forward(x, packed_params):
    """x: (B, input_shape) f32.
    packed_params: (w1 (F_pad,128) bf16, wmid (4,128,128) bf16, w6 (128,F_pad) bf16,
                    bstk (8,128) f32, b6 (1,F_pad) f32)."""
    w1, wmid, w6, bstk, b6 = packed_params
    B, F = x.shape
    F_pad = w1.shape[0]
    assert w6.shape[1] == F_pad and b6.shape[1] == F_pad

    tile_b, B_pad = _choose_tiling(B)

    # Input streamed in bf16 (the layer-1 MXU operand is bf16 anyway).
    x_pad = jnp.zeros((B_pad, F_pad), jnp.bfloat16).at[:B, :F].set(x.astype(jnp.bfloat16))

    in_specs = [
        pl.BlockSpec((tile_b, F_pad), lambda i: (i, 0)),      # x: batch-tiled
        pl.BlockSpec(w1.shape, lambda i: (0, 0)),             # weights/biases resident
        pl.BlockSpec(wmid.shape, lambda i: (0, 0, 0)),
        pl.BlockSpec(w6.shape, lambda i: (0, 0)),
        pl.BlockSpec(bstk.shape, lambda i: (0, 0)),
        pl.BlockSpec(b6.shape, lambda i: (0, 0)),
    ]

    # Advisory cost estimate for the XLA scheduler.
    flops = 2 * B_pad * (F_pad * 128 + 4 * 128 * 128 + 128 * F_pad)
    transcendentals = B_pad * (128 + F_pad)          # the two sigmoid layers
    param_bytes = sum(a.size * a.dtype.itemsize for a in (w1, wmid, w6, bstk, b6))
    bytes_accessed = x_pad.size * 2 + param_bytes + B_pad * F_pad * 4
    cost = pl.CostEstimate(flops=flops, transcendentals=transcendentals,
                           bytes_accessed=bytes_accessed)

    kernel = functools.partial(autoencoder_kernel,
                               elementwise_bf16=_use_bf16_elementwise())

    out_pad = pl.pallas_call(
        kernel,
        out_shape=jax.ShapeDtypeStruct((B_pad, F_pad), jnp.float32),
        grid_spec=pltpu.PrefetchScalarGridSpec(
            num_scalar_prefetch=0,
            grid=(B_pad // tile_b,),
            in_specs=in_specs,
            out_specs=pl.BlockSpec((tile_b, F_pad), lambda i: (i, 0)),
        ),
        compiler_params=pltpu.CompilerParams(
            dimension_semantics=("parallel",),
        ),
        cost_estimate=cost,
    )(x_pad, w1, wmid, w6, bstk, b6)

    return out_pad[:B, :F]


# ---------------------------------------------------------------------------
# Parameter construction / packing (matches the PyTorch module's layer shapes).
# ---------------------------------------------------------------------------

def init_params(input_shape, key):
    """PyTorch Linear init (uniform +-1/sqrt(fan_in)); weights stored as (in, out)."""
    dims = [input_shape, 128, 64, 32, 64, 128, input_shape]
    params = []
    for i in range(6):
        fan_in, fan_out = dims[i], dims[i + 1]
        key, kw, kb = jax.random.split(key, 3)
        bound = 1.0 / jnp.sqrt(fan_in)
        w = jax.random.uniform(kw, (fan_in, fan_out), jnp.float32, -bound, bound)
        b = jax.random.uniform(kb, (1, fan_out), jnp.float32, -bound, bound)
        params.append((w, b))
    return params


def pack_params(params, lane=128):
    """Zero-pad every dim to a multiple of 128 and consolidate operands:
       w1 (F_pad,128) bf16 | wmid (4,128,128) bf16 | w6 (128,F_pad) bf16
       bstk (8,128) f32 (rows 0..4 = biases 1..5) | b6 (1,F_pad) f32.
    Zero padding guarantees padded lanes never leak into real lanes."""
    F = params[0][0].shape[0]
    F_pad = _round_up(F, lane)

    def pad_w(w, rows, cols):
        return (jnp.zeros((rows, cols), jnp.float32)
                .at[:w.shape[0], :w.shape[1]].set(w).astype(jnp.bfloat16))

    w1 = pad_w(params[0][0], F_pad, 128)
    wmid = jnp.stack([pad_w(params[i][0], 128, 128) for i in range(1, 5)], axis=0)
    w6 = pad_w(params[5][0], 128, F_pad)

    bstk = jnp.zeros((8, 128), jnp.float32)
    for i in range(5):
        b = params[i][1].reshape(-1)
        bstk = bstk.at[i, :b.shape[0]].set(b)
    b6 = jnp.zeros((1, F_pad), jnp.float32).at[:, :params[5][1].shape[1]].set(params[5][1])
    return (w1, wmid, w6, bstk, b6)


# ---------------------------------------------------------------------------
# References
# ---------------------------------------------------------------------------

def reference_forward_matched(x, packed_params, elementwise_bf16):
    """Pure-JAX reference with numerics identical to the kernel (padded, bf16 MXU
    operands, optional bf16 bias/ReLU, f32 accumulation)."""
    w1, wmid, w6, bstk, b6 = packed_params
    B, F = x.shape
    F_pad = w1.shape[0]
    a = jnp.zeros((B, F_pad), jnp.bfloat16).at[:, :F].set(x.astype(jnp.bfloat16))

    def relu_layer(a, w, b_row):
        z = jnp.dot(a.astype(jnp.bfloat16), w, preferred_element_type=jnp.float32)
        if elementwise_bf16:
            z = z.astype(jnp.bfloat16) + b_row.astype(jnp.bfloat16)
        else:
            z = z + b_row
        return jnp.maximum(z, 0.0)

    def sigmoid_layer(a, w, b_row):
        z = jnp.dot(a.astype(jnp.bfloat16), w, preferred_element_type=jnp.float32)
        return jax.nn.sigmoid(z + b_row)

    a = relu_layer(a, w1, bstk[0:1, :])
    a = relu_layer(a, wmid[0], bstk[1:2, :])
    code = sigmoid_layer(a, wmid[1], bstk[2:3, :])
    a = relu_layer(code, wmid[2], bstk[3:4, :])
    a = relu_layer(a, wmid[3], bstk[4:5, :])
    out = sigmoid_layer(a, w6, b6)
    return out[:, :F]


def reference_forward_f32(x, params):
    """Pure-f32 semantic reference (matches the PyTorch forward exactly)."""
    a = x
    acts = ["relu", "relu", "sigmoid", "relu", "relu", "sigmoid"]
    for (w, b), act in zip(params, acts):
        a = a @ w + b
        a = jnp.maximum(a, 0.0) if act == "relu" else jax.nn.sigmoid(a)
    return a


if __name__ == "__main__":
    key = jax.random.PRNGKey(0)
    B, INPUT_SHAPE = 8, 64

    kx, kp = jax.random.split(key)
    x = jax.random.normal(kx, (B, INPUT_SHAPE), jnp.float32)
    params = init_params(INPUT_SHAPE, kp)
    packed = pack_params(params)

    out = autoencoder_forward(x, packed)
    out = jax.block_until_ready(out)
    assert out.shape == (B, INPUT_SHAPE)

    # Tight check vs. a numerics-matched reference (same bf16/f32 mixed path).
    ref_matched = reference_forward_matched(x, packed, _use_bf16_elementwise())
    assert jnp.allclose(out, ref_matched, atol=2e-3, rtol=2e-3), "mismatch vs matched reference"

    # Loose semantic check vs. the full-f32 PyTorch-equivalent forward
    # (slack accounts for bf16 MXU operands / bf16 elementwise on v6e+).
    ref_f32 = reference_forward_f32(x, params)
    assert jnp.allclose(out, ref_f32, atol=6e-2, rtol=6e-2), "mismatch vs f32 reference"

    print("KERNEL_OK")
</pallas_src>

<mosaic_0001>
module attributes {stable_mosaic.version = 11 : i64} {
  func.func @autoencoder_kernel(%arg0: i32, %arg1: memref<8x128xbf16, #tpu.memory_space<vmem>>, %arg2: memref<128x128xbf16, #tpu.memory_space<vmem>>, %arg3: memref<4x128x128xbf16, #tpu.memory_space<vmem>>, %arg4: memref<128x128xbf16, #tpu.memory_space<vmem>>, %arg5: memref<8x128xf32, #tpu.memory_space<vmem>>, %arg6: memref<1x128xf32, #tpu.memory_space<vmem>>, %arg7: memref<8x128xf32, #tpu.memory_space<vmem>>) attributes {dimension_semantics = [#tpu.dimension_semantics<parallel>], iteration_bounds = array<i64: 1>, scalar_prefetch = 0 : i64, scratch_operands = 0 : i64, tpu.core_type = #tpu.core_type<tc>, window_params = [{transform_indices = @transform_0, window_bounds = array<i64: 8, 128>}, {pipeline_mode = #tpu.pipeline_mode<synchronous>, transform_indices = @transform_1, window_bounds = array<i64: 128, 128>}, {pipeline_mode = #tpu.pipeline_mode<synchronous>, transform_indices = @transform_2, window_bounds = array<i64: 4, 128, 128>}, {pipeline_mode = #tpu.pipeline_mode<synchronous>, transform_indices = @transform_3, window_bounds = array<i64: 128, 128>}, {pipeline_mode = #tpu.pipeline_mode<synchronous>, transform_indices = @transform_4, window_bounds = array<i64: 8, 128>}, {pipeline_mode = #tpu.pipeline_mode<synchronous>, transform_indices = @transform_5, window_bounds = array<i64: 1, 128>}, {transform_indices = @transform_6, window_bounds = array<i64: 8, 128>}]} {
    %c0 = arith.constant 0 : index
    %c0_0 = arith.constant 0 : index
    %0 = vector.load %arg1[%c0, %c0_0] : memref<8x128xbf16, #tpu.memory_space<vmem>>, vector<8x128xbf16>
    %c0_1 = arith.constant 0 : index
    %c0_2 = arith.constant 0 : index
    %1 = vector.load %arg2[%c0_1, %c0_2] : memref<128x128xbf16, #tpu.memory_space<vmem>>, vector<128x128xbf16>
    %c0_3 = arith.constant 0 : index
    %c0_4 = arith.constant 0 : index
    %2 = vector.load %arg5[%c0_3, %c0_4] : memref<8x128xf32, #tpu.memory_space<vmem>>, vector<1x128xf32>
    %cst = arith.constant dense<0.000000e+00> : vector<8x128xf32>
    %3 = tpu.matmul %0, %1, %cst {dimension_numbers = #tpu.dot_dimension_numbers<[1], [0], [0], [1], [0, 0, 1, 1], [], []>} : vector<8x128xbf16>, vector<128x128xbf16>, vector<8x128xf32> -> vector<8x128xf32>
    %4 = vector.broadcast %2 : vector<1x128xf32> to vector<8x128xf32>
    %5 = arith.addf %3, %4 : vector<8x128xf32>
    %cst_5 = arith.constant 0.000000e+00 : f32
    %6 = vector.broadcast %cst_5 : f32 to vector<8x128xf32>
    %7 = arith.maximumf %5, %6 : vector<8x128xf32>
    %c0_6 = arith.constant 0 : index
    %c0_7 = arith.constant 0 : index
    %c0_8 = arith.constant 0 : index
    %8 = vector.load %arg3[%c0_6, %c0_7, %c0_8] : memref<4x128x128xbf16, #tpu.memory_space<vmem>>, vector<1x128x128xbf16>
    %9 = vector.shape_cast %8 : vector<1x128x128xbf16> to vector<128x128xbf16>
    %c1 = arith.constant 1 : index
    %c0_9 = arith.constant 0 : index
    %10 = vector.load %arg5[%c1, %c0_9] : memref<8x128xf32, #tpu.memory_space<vmem>>, vector<1x128xf32>
    %11 = arith.truncf %7 : vector<8x128xf32> to vector<8x128xbf16>
    %cst_10 = arith.constant dense<0.000000e+00> : vector<8x128xf32>
    %12 = tpu.matmul %11, %9, %cst_10 {dimension_numbers = #tpu.dot_dimension_numbers<[1], [0], [0], [1], [0, 0, 1, 1], [], []>} : vector<8x128xbf16>, vector<128x128xbf16>, vector<8x128xf32> -> vector<8x128xf32>
    %13 = vector.broadcast %10 : vector<1x128xf32> to vector<8x128xf32>
    %14 = arith.addf %12, %13 : vector<8x128xf32>
    %cst_11 = arith.constant 0.000000e+00 : f32
    %15 = vector.broadcast %cst_11 : f32 to vector<8x128xf32>
    %16 = arith.maximumf %14, %15 : vector<8x128xf32>
    %c1_12 = arith.constant 1 : index
    %c0_13 = arith.constant 0 : index
    %c0_14 = arith.constant 0 : index
    %17 = vector.load %arg3[%c1_12, %c0_13, %c0_14] : memref<4x128x128xbf16, #tpu.memory_space<vmem>>, vector<1x128x128xbf16>
    %18 = vector.shape_cast %17 : vector<1x128x128xbf16> to vector<128x128xbf16>
    %c2 = arith.constant 2 : index
    %c0_15 = arith.constant 0 : index
    %19 = vector.load %arg5[%c2, %c0_15] : memref<8x128xf32, #tpu.memory_space<vmem>>, vector<1x128xf32>
    %20 = arith.truncf %16 : vector<8x128xf32> to vector<8x128xbf16>
    %cst_16 = arith.constant dense<0.000000e+00> : vector<8x128xf32>
    %21 = tpu.matmul %20, %18, %cst_16 {dimension_numbers = #tpu.dot_dimension_numbers<[1], [0], [0], [1], [0, 0, 1, 1], [], []>} : vector<8x128xbf16>, vector<128x128xbf16>, vector<8x128xf32> -> vector<8x128xf32>
    %22 = vector.broadcast %19 : vector<1x128xf32> to vector<8x128xf32>
    %23 = arith.addf %21, %22 : vector<8x128xf32>
    %24 = arith.negf %23 : vector<8x128xf32>
    %25 = math.exp %24 : vector<8x128xf32>
    %cst_17 = arith.constant 1.000000e+00 : f32
    %26 = vector.broadcast %cst_17 : f32 to vector<8x128xf32>
    %27 = arith.addf %26, %25 : vector<8x128xf32>
    %28 = arith.divf %26, %27 : vector<8x128xf32>
    %c2_18 = arith.constant 2 : index
    %c0_19 = arith.constant 0 : index
    %c0_20 = arith.constant 0 : index
    %29 = vector.load %arg3[%c2_18, %c0_19, %c0_20] : memref<4x128x128xbf16, #tpu.memory_space<vmem>>, vector<1x128x128xbf16>
    %30 = vector.shape_cast %29 : vector<1x128x128xbf16> to vector<128x128xbf16>
    %c3 = arith.constant 3 : index
    %c0_21 = arith.constant 0 : index
    %31 = vector.load %arg5[%c3, %c0_21] : memref<8x128xf32, #tpu.memory_space<vmem>>, vector<1x128xf32>
    %32 = arith.truncf %28 : vector<8x128xf32> to vector<8x128xbf16>
    %cst_22 = arith.constant dense<0.000000e+00> : vector<8x128xf32>
    %33 = tpu.matmul %32, %30, %cst_22 {dimension_numbers = #tpu.dot_dimension_numbers<[1], [0], [0], [1], [0, 0, 1, 1], [], []>} : vector<8x128xbf16>, vector<128x128xbf16>, vector<8x128xf32> -> vector<8x128xf32>
    %34 = vector.broadcast %31 : vector<1x128xf32> to vector<8x128xf32>
    %35 = arith.addf %33, %34 : vector<8x128xf32>
    %cst_23 = arith.constant 0.000000e+00 : f32
    %36 = vector.broadcast %cst_23 : f32 to vector<8x128xf32>
    %37 = arith.maximumf %35, %36 : vector<8x128xf32>
    %c3_24 = arith.constant 3 : index
    %c0_25 = arith.constant 0 : index
    %c0_26 = arith.constant 0 : index
    %38 = vector.load %arg3[%c3_24, %c0_25, %c0_26] : memref<4x128x128xbf16, #tpu.memory_space<vmem>>, vector<1x128x128xbf16>
    %39 = vector.shape_cast %38 : vector<1x128x128xbf16> to vector<128x128xbf16>
    %c4 = arith.constant 4 : index
    %c0_27 = arith.constant 0 : index
    %40 = vector.load %arg5[%c4, %c0_27] : memref<8x128xf32, #tpu.memory_space<vmem>>, vector<1x128xf32>
    %41 = arith.truncf %37 : vector<8x128xf32> to vector<8x128xbf16>
    %cst_28 = arith.constant dense<0.000000e+00> : vector<8x128xf32>
    %42 = tpu.matmul %41, %39, %cst_28 {dimension_numbers = #tpu.dot_dimension_numbers<[1], [0], [0], [1], [0, 0, 1, 1], [], []>} : vector<8x128xbf16>, vector<128x128xbf16>, vector<8x128xf32> -> vector<8x128xf32>
    %43 = vector.broadcast %40 : vector<1x128xf32> to vector<8x128xf32>
    %44 = arith.addf %42, %43 : vector<8x128xf32>
    %cst_29 = arith.constant 0.000000e+00 : f32
    %45 = vector.broadcast %cst_29 : f32 to vector<8x128xf32>
    %46 = arith.maximumf %44, %45 : vector<8x128xf32>
    %c0_30 = arith.constant 0 : index
    %c0_31 = arith.constant 0 : index
    %47 = vector.load %arg4[%c0_30, %c0_31] : memref<128x128xbf16, #tpu.memory_space<vmem>>, vector<128x128xbf16>
    %c0_32 = arith.constant 0 : index
    %c0_33 = arith.constant 0 : index
    %48 = vector.load %arg6[%c0_32, %c0_33] : memref<1x128xf32, #tpu.memory_space<vmem>>, vector<1x128xf32>
    %49 = arith.truncf %46 : vector<8x128xf32> to vector<8x128xbf16>
    %cst_34 = arith.constant dense<0.000000e+00> : vector<8x128xf32>
    %50 = tpu.matmul %49, %47, %cst_34 {dimension_numbers = #tpu.dot_dimension_numbers<[1], [0], [0], [1], [0, 0, 1, 1], [], []>} : vector<8x128xbf16>, vector<128x128xbf16>, vector<8x128xf32> -> vector<8x128xf32>
    %51 = vector.broadcast %48 : vector<1x128xf32> to vector<8x128xf32>
    %52 = arith.addf %50, %51 : vector<8x128xf32>
    %53 = arith.negf %52 : vector<8x128xf32>
    %54 = math.exp %53 : vector<8x128xf32>
    %cst_35 = arith.constant 1.000000e+00 : f32
    %55 = vector.broadcast %cst_35 : f32 to vector<8x128xf32>
    %56 = arith.addf %55, %54 : vector<8x128xf32>
    %57 = arith.divf %55, %56 : vector<8x128xf32>
    %c0_36 = arith.constant 0 : index
    %c0_37 = arith.constant 0 : index
    %58 = vector.load %arg7[%c0_36, %c0_37] : memref<8x128xf32, #tpu.memory_space<vmem>>, vector<8x128xf32>
    tpu.vector_store %arg7[%c0_36, %c0_37], %57 {strides = array<i32>} : memref<8x128xf32, #tpu.memory_space<vmem>>, vector<8x128xf32>,
    return
  }
  func.func @transform_0(%arg0: i32) -> (i32, i32) {
    %c0_i32 = arith.constant 0 : i32
    %c0_i32_0 = arith.constant 0 : i32
    return %arg0, %c0_i32 : i32, i32
  }
  func.func @transform_1(%arg0: i32) -> (i32, i32) {
    %c0_i32 = arith.constant 0 : i32
    %c0_i32_0 = arith.constant 0 : i32
    %c0_i32_1 = arith.constant 0 : i32
    return %c0_i32, %c0_i32_0 : i32, i32
  }
  func.func @transform_2(%arg0: i32) -> (i32, i32, i32) {
    %c0_i32 = arith.constant 0 : i32
    %c0_i32_0 = arith.constant 0 : i32
    %c0_i32_1 = arith.constant 0 : i32
    %c0_i32_2 = arith.constant 0 : i32
    return %c0_i32, %c0_i32_0, %c0_i32_1 : i32, i32, i32
  }
  func.func @transform_3(%arg0: i32) -> (i32, i32) {
    %c0_i32 = arith.constant 0 : i32
    %c0_i32_0 = arith.constant 0 : i32
    %c0_i32_1 = arith.constant 0 : i32
    return %c0_i32, %c0_i32_0 : i32, i32
  }
  func.func @transform_4(%arg0: i32) -> (i32, i32) {
    %c0_i32 = arith.constant 0 : i32
    %c0_i32_0 = arith.constant 0 : i32
    %c0_i32_1 = arith.constant 0 : i32
    return %c0_i32, %c0_i32_0 : i32, i32
  }
  func.func @transform_5(%arg0: i32) -> (i32, i32) {
    %c0_i32 = arith.constant 0 : i32
    %c0_i32_0 = arith.constant 0 : i32
    %c0_i32_1 = arith.constant 0 : i32
    return %c0_i32, %c0_i32_0 : i32, i32
  }
  func.func @transform_6(%arg0: i32) -> (i32, i32) {
    %c0_i32 = arith.constant 0 : i32
    %c0_i32_0 = arith.constant 0 : i32
    return %arg0, %c0_i32 : i32, i32
  }
}

</mosaic_0001>

<bundles_post_ra>
// kernel: tpu_custom_call.1
= control target key start
LH: loop header
LB: loop body
LE: loop exit
PB: predicated region body
PF: predicated region fallthrough
CT: control target
= control target key end

     0   :  { %11 = vsyncpa [#allocation3], 0  ;;  %s1347_s0 = inlined_call_operand.hbm [shape: bf16[8,128], index: 0, kind: input, shape index: {}]   ;;  %s1348_s1 = inlined_call_operand.hbm [shape: bf16[128,128], index: 1, kind: input, shape index: {}]   ;;  %s1349_s2 = inlined_call_operand.hbm [shape: bf16[4,128,128], index: 2, kind: input, shape index: {}]   ;;  %s1350_s3 = inlined_call_operand.hbm [shape: bf16[128,128], index: 3, kind: input, shape index: {}]   ;;  %s1351_s4 = inlined_call_operand.hbm [shape: f32[8,128], index: 4, kind: input, shape index: {}]   ;;  %s1352_s5 = inlined_call_operand.vmem [shape: f32[1,128], index: 5, kind: input, shape index: {}]   ;;  %s1353_s6 = inlined_call_operand.hbm [shape: f32[8,128], index: 6, kind: output, shape index: {}]  }
   0x1   :  { %12 = vsyncpa [#allocation6], 0 }
   0x2   :  { %13 = vsyncpa [#allocation9], 0 }
   0x3   :  { %14 = vsyncpa [#allocation4], 0  ;;  %s1212_s21 = smov [#allocation5]  }
   0x4   :  { %s30_s22 = sshll.u32 %s1212_s21, 4  ;;  %s31_s22 = int_to_ptr.vmem [resolvable:$true] %s30_s22 }
   0x5   :  { %s1092_s23 = scalar_lea.vmem %s31_s22, 1024  ;;  %p1097_p1 = scmp.lt.s32.totalorder %s31_s22, %s31_s22 }
   0x6   :  { %p1093_p0 = scmp.ne.s32.totalorder %s31_s22, %s1092_s23  ;;  %p1098_p2 = scmp.lt.s32.totalorder %s1092_s23, %s1092_s23 }
   0x8   :  { %p1099_p3 = por %p1098_p2, %p1097_p1 }
   0xa   :  { %p1100_p4 = pnand %p1099_p3, %p1093_p0 }
   0xc   :  { %1103 = shalt.err (!%p1100_p4)
}
   0xd   :  { %s1213_s24 = smov 64   ;;  %s1214_s25 = smov 4  }
   0xe   :  { %36 = dma.hbm_to_vmem [thread:$0]  %s1348_s1, 1024, %s31_s22, [#allocation6], %s1213_s24, %s1213_s24, %s1214_s25  }
   0xf   :  { %s1215_s28 = smov [#allocation8]   ;;  %s1216_s30 = smov [#allocation2]  }
  0x10   :  { %s54_s29 = sshll.u32 %s1215_s28, 4  ;;  %s21_s7 = sshll.u32 %s1216_s30, 4  ;;  %s55_s29 = int_to_ptr.vmem [resolvable:$true] %s54_s29  ;;  %s22_s7 = int_to_ptr.vmem [resolvable:$true] %s21_s7 }
  0x11   :  { %s1112_s8 = scalar_lea.vmem %s55_s29, 1024  ;;  %p1117_p6 = scmp.lt.s32.totalorder %s55_s29, %s55_s29 }
  0x12   :  { %p1113_p5 = scmp.ne.s32.totalorder %s55_s29, %s1112_s8  ;;  %p1118_p7 = scmp.lt.s32.totalorder %s1112_s8, %s1112_s8 }
  0x14   :  { %p1119_p8 = por %p1118_p7, %p1117_p6 }
  0x16   :  { %p1120_p9 = pnand %p1119_p8, %p1113_p5 }
  0x18   :  { %1123 = shalt.err (!%p1120_p9)
}
  0x19   :  { %60 = dma.hbm_to_vmem [thread:$0]  %s1350_s3, 1024, %s55_s29, [#allocation9], %s1213_s24, %s1213_s24, %s1214_s25  }
  0x1a   :  { %s1132_s1 = scalar_lea.vmem %s22_s7, 64  ;;  %p1137_p11 = scmp.lt.s32.totalorder %s22_s7, %s22_s7 }
  0x1b   :  { %p1133_p10 = scmp.ne.s32.totalorder %s22_s7, %s1132_s1  ;;  %p1138_p12 = scmp.lt.s32.totalorder %s1132_s1, %s1132_s1 }
  0x1d   :  { %p1139_p13 = por %p1138_p12, %p1137_p11 }
  0x1f   :  { %p1140_p0 = pnand %p1139_p13, %p1133_p10 }
  0x21   :  { %1143 = shalt.err (!%p1140_p0)
}
  0x22   :  { %24 = dma.hbm_to_vmem [thread:$0]  %s1347_s0, 64, %s22_s7, [#allocation3]  }
  0x23   :  { %s1217_s13 = smov [#allocation7]   ;;  %s1218_s15 = smov [#allocation10]  }
  0x24   :  { %s42_s14 = sshll.u32 %s1217_s13, 4  ;;  %s67_s16 = sshll.u32 %s1218_s15, 4  ;;  %s43_s14 = int_to_ptr.vmem [resolvable:$true] %s42_s14  ;;  %s68_s16 = int_to_ptr.vmem [resolvable:$true] %s67_s16 }
  0x25   :  { %s1152_s17 = scalar_lea.vmem %s43_s14, 4096  ;;  %p1157_p2 = scmp.lt.s32.totalorder %s43_s14, %s43_s14 }
  0x26   :  { %p1153_p1 = scmp.ne.s32.totalorder %s43_s14, %s1152_s17  ;;  %p1158_p3 = scmp.lt.s32.totalorder %s1152_s17, %s1152_s17 }
  0x28   :  { %p1159_p4 = por %p1158_p3, %p1157_p2 }
  0x2a   :  { %p1160_p5 = pnand %p1159_p4, %p1153_p1 }
  0x2c   :  { %1163 = shalt.err (!%p1160_p5)
}
  0x2d   :  { %48 = dma.hbm_to_vmem [thread:$0]  %s1349_s2, 4096, %s43_s14, [#allocation6], %s1213_s24, %s1213_s24, %s1214_s25  }
  0x2e   :  { %s1172_s0 = scalar_lea.vmem %s68_s16, 128  ;;  %p1177_p7 = scmp.lt.s32.totalorder %s68_s16, %s68_s16 }
  0x2f   :  { %p1173_p6 = scmp.ne.s32.totalorder %s68_s16, %s1172_s0  ;;  %p1178_p8 = scmp.lt.s32.totalorder %s1172_s0, %s1172_s0 }
  0x31   :  { %p1179_p9 = por %p1178_p8, %p1177_p7 }
  0x33   :  { %p1180_p10 = pnand %p1179_p9, %p1173_p6 }
  0x35   :  { %1183 = shalt.err (!%p1180_p10)
}
  0x36   :  { %70 = dma.hbm_to_vmem [thread:$0]  %s1351_s4, 128, %s68_s16, [#allocation9]  }
  0x37   :  { %1204 = dma.done.wait [#allocation3], 64  }
  0x38   :  { %1205 = vsyncadd [#allocation3], 4294967232 }
  0x39   :  { %1206 = dma.done.wait [#allocation6], 5120  }
  0x3a   :  { %1207 = vsyncadd [#allocation6], 4294962176 }
  0x3b   :  { %1208 = dma.done.wait [#allocation9], 1152  }
  0x3c   :  { %1209 = vsyncadd [#allocation9], 4294966144  ;;  %v1219_v0 = vmov 0.0   ;;  %vm1220_vm0 = vmmov 0   ;;  %v1028_v1 = vld [vmem:[#allocation5 + $0x38] sm:$0xff]   ;;  %v1029_v2 = vld [vmem:[#allocation5 + $0x30] sm:$0xff]  }
  0x3d   :  { %898 = vmatprep.subr.bf16.mxu0 %v1219_v0  ;;  %914 = vmatprep.mubr.msk.bf16.mxu0 %vm1220_vm0, %v1219_v0  ;;  %v1030_v3 = vld [vmem:[#allocation5 + $0x28] sm:$0xff]   ;;  %v1036_v4 = vld [vmem:[#allocation7 + $0x38] sm:$0xff]   ;;  %v1031_v5 = vld [vmem:[#allocation5 + $0x20] sm:$0xff]   ;;  %s1221_s21 = smov [#allocation11]  }
  0x3e   :  { %918 = vmatprep.subr.bf16.mxu1 %v1219_v0  ;;  %934 = vmatprep.mubr.msk.bf16.mxu1 %vm1220_vm0, %v1219_v0  ;;  %v1037_v6 = vld [vmem:[#allocation7 + $0x30] sm:$0xff]   ;;  %v1032_v7 = vld [vmem:[#allocation5 + $0x18] sm:$0xff]   ;;  %v1038_v8 = vld [vmem:[#allocation7 + $0x28] sm:$0xff]   ;;  %s777_s22 = sshll.u32 %s1221_s21, 4  ;;  %s778_s22 = int_to_ptr.vmem [resolvable:$true] %s777_s22 }
  0x3f   :  { %899 = vmatpush3.bf16.msra.mxu0 %v1028_v1  ;;  %919 = vmatpush3.bf16.msra.mxu1 %v1036_v4  ;;  %v1033_v9 = vld [vmem:[#allocation5 + $0x10] sm:$0xff]   ;;  %v1039_v10 = vld [vmem:[#allocation7 + $0x20] sm:$0xff]   ;;  %v1034_v11 = vld [vmem:[#allocation5 + $0x8] sm:$0xff]   ;;  %s1184_s23 = scalar_lea.vmem %s778_s22, 128  ;;  %p1189_p12 = scmp.lt.s32.totalorder %s778_s22, %s778_s22 }
  0x40   :  { %900 = vmatprep.subr.bf16.mxu0 %v1219_v0  ;;  %920 = vmatprep.subr.bf16.mxu1 %v1219_v0  ;;  %v1040_v12 = vld [vmem:[#allocation7 + $0x18] sm:$0xff]   ;;  %v1035_v13 = vld [vmem:[#allocation5] sm:$0xff]   ;;  %v1041_v14 = vld [vmem:[#allocation7 + $0x10] sm:$0xff]   ;;  %p1185_p11 = scmp.ne.s32.totalorder %s778_s22, %s1184_s23  ;;  %p1190_p13 = scmp.lt.s32.totalorder %s1184_s23, %s1184_s23 }
  0x41   :  { %v89_v15 = vld [vmem:[#allocation2] sm:$0xf]  ;;  %v1042_v16 = vld [vmem:[#allocation7 + $0x8] sm:$0xff]   ;;  %v1043_v17 = vld [vmem:[#allocation7] sm:$0xff]  }
  0x42   :  { %v1044_v18 = vld [vmem:[#allocation7 + $0x78] sm:$0xff]   ;;  %v1045_v19 = vld [vmem:[#allocation7 + $0x70] sm:$0xff]   ;;  %v1046_v20 = vld [vmem:[#allocation7 + $0x68] sm:$0xff]   ;;  %p1191_p0 = por %p1190_p13, %p1189_p12 }
  0x43   :  { %901 = vmatpush3.bf16.msra.mxu0 %v1029_v2  ;;  %921 = vmatpush3.bf16.msra.mxu1 %v1037_v6  ;;  %v1047_v21 = vld [vmem:[#allocation7 + $0x60] sm:$0xff]   ;;  %v1048_v22 = vld [vmem:[#allocation7 + $0x58] sm:$0xff]   ;;  %v1049_v23 = vld [vmem:[#allocation7 + $0x50] sm:$0xff]  }
  0x44   :  { %902 = vmatprep.subr.bf16.mxu0 %v1219_v0  ;;  %922 = vmatprep.subr.bf16.mxu1 %v1219_v0  ;;  %v788_v24 = vld [vmem:[#allocation10] ss:$0 sm:$0xff]  ;;  %v1050_v32 = vld [vmem:[#allocation7 + $0x48] sm:$0xff]   ;;  %v797_v34 = vld [vmem:[#allocation10 + $0x1] ss:$0 sm:$0xff]  ;;  %p1192_p1 = pnand %p1191_p0, %p1185_p11 }
  0x45   :  { %v1051_v33 = vld [vmem:[#allocation7 + $0x40] sm:$0xff]   ;;  %v1052_v42 = vld [vmem:[#allocation7 + $0xb8] sm:$0xff]   ;;  %v1053_v43 = vld [vmem:[#allocation7 + $0xb0] sm:$0xff]  }
  0x46   :  { %v1054_v44 = vld [vmem:[#allocation7 + $0xa8] sm:$0xff]   ;;  %v1055_v45 = vld [vmem:[#allocation7 + $0xa0] sm:$0xff]   ;;  %v1056_v46 = vld [vmem:[#allocation7 + $0x98] sm:$0xff]  }
  0x47   :  { %903 = vmatpush3.bf16.msra.mxu0 %v1030_v3  ;;  %923 = vmatpush3.bf16.msra.mxu1 %v1038_v8  ;;  %v1057_v47 = vld [vmem:[#allocation7 + $0x90] sm:$0xff]   ;;  %v1058_v48 = vld [vmem:[#allocation7 + $0x88] sm:$0xff]   ;;  %v1059_v49 = vld [vmem:[#allocation7 + $0x80] sm:$0xff]  }
  0x48   :  { %904 = vmatprep.subr.bf16.mxu0 %v1219_v0  ;;  %924 = vmatprep.subr.bf16.mxu1 %v1219_v0  ;;  %v1060_v50 = vld [vmem:[#allocation7 + $0xf8] sm:$0xff]   ;;  %v1061_v51 = vld [vmem:[#allocation7 + $0xf0] sm:$0xff]   ;;  %v1062_v52 = vld [vmem:[#allocation7 + $0xe8] sm:$0xff]  }
  0x49   :  { %v1063_v53 = vld [vmem:[#allocation7 + $0xe0] sm:$0xff]   ;;  %v1064_v54 = vld [vmem:[#allocation7 + $0xd8] sm:$0xff]   ;;  %v1065_v55 = vld [vmem:[#allocation7 + $0xd0] sm:$0xff]  }
  0x4a   :  { %v806_v56 = vld [vmem:[#allocation10 + $0x2] ss:$0 sm:$0xff]  ;;  %v1066_v4 = vld [vmem:[#allocation7 + $0xc8] sm:$0xff]   ;;  %v1068_v6 = vld [vmem:[#allocation8 + $0x38] sm:$0xff]  }
  0x4b   :  { %905 = vmatpush3.bf16.msra.mxu0 %v1031_v5  ;;  %925 = vmatpush3.bf16.msra.mxu1 %v1039_v10  ;;  %v1067_v5 = vld [vmem:[#allocation7 + $0xc0] sm:$0xff]   ;;  %v1070_v8 = vld [vmem:[#allocation8 + $0x28] sm:$0xff]   ;;  %v1072_v10 = vld [vmem:[#allocation8 + $0x18] sm:$0xff]  }
  0x4c   :  { %906 = vmatprep.subr.bf16.mxu0 %v1219_v0  ;;  %926 = vmatprep.subr.bf16.mxu1 %v1219_v0 }
  0x4f   :  { %907 = vmatpush3.bf16.msra.mxu0 %v1032_v7  ;;  %927 = vmatpush3.bf16.msra.mxu1 %v1040_v12  ;;  %v1069_v7 = vld [vmem:[#allocation8 + $0x30] sm:$0xff]   ;;  %v816_v12 = vld [vmem:[#allocation10 + $0x3] ss:$0 sm:$0xff] }
  0x50   :  { %908 = vmatprep.subr.bf16.mxu0 %v1219_v0  ;;  %928 = vmatprep.subr.bf16.mxu1 %v1219_v0 }
  0x53   :  { %909 = vmatpush3.bf16.msra.mxu0 %v1033_v9  ;;  %929 = vmatpush3.bf16.msra.mxu1 %v1041_v14  ;;  %v1071_v9 = vld [vmem:[#allocation8 + $0x20] sm:$0xff]  }
  0x54   :  { %910 = vmatprep.subr.bf16.mxu0 %v1219_v0  ;;  %930 = vmatprep.subr.bf16.mxu1 %v1219_v0 }
  0x57   :  { %911 = vmatpush3.bf16.msra.mxu0 %v1034_v11  ;;  %931 = vmatpush3.bf16.msra.mxu1 %v1042_v16  ;;  %v1073_v11 = vld [vmem:[#allocation8 + $0x10] sm:$0xff]  }
  0x58   :  { %912 = vmatprep.subr.bf16.mxu0 %v1219_v0  ;;  %932 = vmatprep.subr.bf16.mxu1 %v1219_v0 }
  0x5b   :  { %913 = vmatpush3.bf16.msra.mxu0 %v1035_v13  ;;  %933 = vmatpush3.bf16.msra.mxu1 %v1043_v17 }
  0x5c   :  { %938 = vmatprep.subr.bf16.mxu0 %v1219_v0  ;;  %958 = vmatprep.subr.bf16.mxu1 %v1219_v0 }
  0x5e   :  { %915 = vmatmul.mubr.bf16.vlgmr.msra.gmra.mxu0 %v89_v15 }
  0x5f   :  { %954 = vmatprep.mubr.msk.bf16.mxu0 %vm1220_vm0, %v1219_v0  ;;  %939 = vmatpush3.bf16.msra.mxu0 %v1044_v18 }
  0x60   :  { %940 = vmatprep.subr.bf16.mxu0 %v1219_v0 }
  0x63   :  { %941 = vmatpush3.bf16.msra.mxu0 %v1045_v19 }
  0x64   :  { %942 = vmatprep.subr.bf16.mxu0 %v1219_v0 }
  0x67   :  { %943 = vmatpush3.bf16.msra.mxu0 %v1046_v20  ;;  %v1074_v20 = vld [vmem:[#allocation8 + $0x8] sm:$0xff]  }
  0x68   :  { %944 = vmatprep.subr.bf16.mxu0 %v1219_v0 }
  0x6b   :  { %945 = vmatpush3.bf16.msra.mxu0 %v1047_v21  ;;  %v1075_v21 = vld [vmem:[#allocation8] sm:$0xff]  }
  0x6c   :  { %946 = vmatprep.subr.bf16.mxu0 %v1219_v0 }
  0x6f   :  { %947 = vmatpush3.bf16.msra.mxu0 %v1048_v22  ;;  %v825_v22 = vld [vmem:[#allocation10 + $0x4] ss:$0 sm:$0xff] }
  0x70   :  { %948 = vmatprep.subr.bf16.mxu0 %v1219_v0 }
  0x73   :  { %949 = vmatpush3.bf16.msra.mxu0 %v1049_v23 }
  0x74   :  { %950 = vmatprep.subr.bf16.mxu0 %v1219_v0 }
  0x77   :  { %951 = vmatpush3.bf16.msra.mxu0 %v1050_v32 }
  0x78   :  { %952 = vmatprep.subr.bf16.mxu0 %v1219_v0 }
  0x7b   :  { %953 = vmatpush3.bf16.msra.mxu0 %v1051_v33 }
  0x7c   :  { %978 = vmatprep.subr.bf16.mxu0 %v1219_v0 }
 0x11e   :  { %v193_v25 = vpop.f32.mrf.mxu0 }
 0x11f   :  { %v194_v26 = vadd.f32 %v788_v24, %v193_v25 }
 0x120   :  { %v916_v27 = vpop.f32.mrf.mxu0 }
 0x121   :  { %v199_v28 = vmax.f32 %v194_v26, 0.0 }
 0x122   :  { %v196_v29 = vpop.f32.mrf.mxu0 }
 0x123   :  { %v217_v30 = vpack.c.bf16 %v199_v28, %v199_v28 }
 0x124   :  { %v917_v31 = vpop.f32.mrf.mxu0 }
 0x125   :  { %935 = vmatmul.mubr.bf16.vlgmr.msra.gmra.mxu1 %v217_v30  ;;  %v834_v30 = vld [vmem:[%s1352_s5] ss:$0 sm:$0xff] }
 0x126   :  { %974 = vmatprep.mubr.msk.bf16.mxu1 %vm1220_vm0, %v1219_v0  ;;  %959 = vmatpush3.bf16.msra.mxu1 %v1052_v42 }
 0x127   :  { %960 = vmatprep.subr.bf16.mxu1 %v1219_v0 }
 0x12a   :  { %961 = vmatpush3.bf16.msra.mxu1 %v1053_v43 }
 0x12b   :  { %962 = vmatprep.subr.bf16.mxu1 %v1219_v0 }
 0x12e   :  { %963 = vmatpush3.bf16.msra.mxu1 %v1054_v44 }
 0x12f   :  { %964 = vmatprep.subr.bf16.mxu1 %v1219_v0 }
 0x132   :  { %965 = vmatpush3.bf16.msra.mxu1 %v1055_v45 }
 0x133   :  { %966 = vmatprep.subr.bf16.mxu1 %v1219_v0 }
 0x136   :  { %967 = vmatpush3.bf16.msra.mxu1 %v1056_v46 }
 0x137   :  { %968 = vmatprep.subr.bf16.mxu1 %v1219_v0 }
 0x13a   :  { %969 = vmatpush3.bf16.msra.mxu1 %v1057_v47 }
 0x13b   :  { %970 = vmatprep.subr.bf16.mxu1 %v1219_v0 }
 0x13e   :  { %971 = vmatpush3.bf16.msra.mxu1 %v1058_v48 }
 0x13f   :  { %972 = vmatprep.subr.bf16.mxu1 %v1219_v0 }
 0x142   :  { %973 = vmatpush3.bf16.msra.mxu1 %v1059_v49 }
 0x143   :  { %998 = vmatprep.subr.bf16.mxu1 %v1219_v0 }
 0x1e5   :  { %v304_v35 = vpop.f32.mrf.mxu1 }
 0x1e6   :  { %v305_v36 = vadd.f32 %v797_v34, %v304_v35 }
 0x1e7   :  { %v936_v37 = vpop.f32.mrf.mxu1 }
 0x1e8   :  { %v310_v38 = vmax.f32 %v305_v36, 0.0 }
 0x1e9   :  { %v307_v39 = vpop.f32.mrf.mxu1 }
 0x1ea   :  { %v329_v40 = vpack.c.bf16 %v310_v38, %v310_v38 }
 0x1eb   :  { %v937_v41 = vpop.f32.mrf.mxu1 }
 0x1ec   :  { %955 = vmatmul.mubr.bf16.vlgmr.msra.gmra.mxu0 %v329_v40 }
 0x1ed   :  { %994 = vmatprep.mubr.msk.bf16.mxu0 %vm1220_vm0, %v1219_v0  ;;  %979 = vmatpush3.bf16.msra.mxu0 %v1060_v50 }
 0x1ee   :  { %980 = vmatprep.subr.bf16.mxu0 %v1219_v0 }
 0x1f1   :  { %981 = vmatpush3.bf16.msra.mxu0 %v1061_v51 }
 0x1f2   :  { %982 = vmatprep.subr.bf16.mxu0 %v1219_v0 }
 0x1f5   :  { %983 = vmatpush3.bf16.msra.mxu0 %v1062_v52 }
 0x1f6   :  { %984 = vmatprep.subr.bf16.mxu0 %v1219_v0 }
 0x1f9   :  { %985 = vmatpush3.bf16.msra.mxu0 %v1063_v53 }
 0x1fa   :  { %986 = vmatprep.subr.bf16.mxu0 %v1219_v0 }
 0x1fd   :  { %987 = vmatpush3.bf16.msra.mxu0 %v1064_v54 }
 0x1fe   :  { %988 = vmatprep.subr.bf16.mxu0 %v1219_v0 }
 0x201   :  { %989 = vmatpush3.bf16.msra.mxu0 %v1065_v55 }
 0x202   :  { %990 = vmatprep.subr.bf16.mxu0 %v1219_v0 }
 0x205   :  { %991 = vmatpush3.bf16.msra.mxu0 %v1066_v4 }
 0x206   :  { %992 = vmatprep.subr.bf16.mxu0 %v1219_v0 }
 0x209   :  { %993 = vmatpush3.bf16.msra.mxu0 %v1067_v5 }
 0x2ac   :  { %v416_v57 = vpop.f32.mrf.mxu0 }
 0x2ad   :  { %v417_v58 = vadd.f32 %v806_v56, %v416_v57 }
 0x2ae   :  { %v956_v59 = vpop.f32.mrf.mxu0 }
 0x2af   :  { %v815_v60 = vmul.f32 -1.442695, %v417_v58 }
 0x2b0   :  { %v419_v61 = vpop.f32.mrf.mxu0 }
 0x2b1   :  { %1076 = vpow2.f32 %v815_v60 }
 0x2b2   :  { %v957_v62 = vpop.f32.mrf.mxu0 }
 0x2be   :  { %v1077_v63 = vpop.eup %1076 }
 0x2bf   :  { %v425_v1 = vadd.f32 1.0, %v1077_v63 }
 0x2c1   :  { %1078 = vrcp.f32 %v425_v1 }
 0x2ce   :  { %v1079_v2 = vpop.eup %1078 }
 0x2cf   :  { %v446_v3 = vpack.c.bf16 %v1079_v2, %v1079_v2 }
 0x2d1   :  { %975 = vmatmul.mubr.bf16.vlgmr.msra.gmra.mxu1 %v446_v3 }
 0x2d2   :  { %1014 = vmatprep.mubr.msk.bf16.mxu1 %vm1220_vm0, %v1219_v0  ;;  %999 = vmatpush3.bf16.msra.mxu1 %v1068_v6 }
 0x2d3   :  { %1000 = vmatprep.subr.bf16.mxu1 %v1219_v0 }
 0x2d6   :  { %1001 = vmatpush3.bf16.msra.mxu1 %v1069_v7 }
 0x2d7   :  { %1002 = vmatprep.subr.bf16.mxu1 %v1219_v0 }
 0x2da   :  { %1003 = vmatpush3.bf16.msra.mxu1 %v1070_v8 }
 0x2db   :  { %1004 = vmatprep.subr.bf16.mxu1 %v1219_v0 }
 0x2de   :  { %1005 = vmatpush3.bf16.msra.mxu1 %v1071_v9 }
 0x2df   :  { %1006 = vmatprep.subr.bf16.mxu1 %v1219_v0 }
 0x2e2   :  { %1007 = vmatpush3.bf16.msra.mxu1 %v1072_v10 }
 0x2e3   :  { %1008 = vmatprep.subr.bf16.mxu1 %v1219_v0 }
 0x2e6   :  { %1009 = vmatpush3.bf16.msra.mxu1 %v1073_v11 }
 0x2e7   :  { %1010 = vmatprep.subr.bf16.mxu1 %v1219_v0 }
 0x2ea   :  { %1011 = vmatpush3.bf16.msra.mxu1 %v1074_v20 }
 0x2eb   :  { %1012 = vmatprep.subr.bf16.mxu1 %v1219_v0 }
 0x2ee   :  { %1013 = vmatpush3.bf16.msra.mxu1 %v1075_v21 }
 0x391   :  { %v533_v13 = vpop.f32.mrf.mxu1 }
 0x392   :  { %v534_v14 = vadd.f32 %v816_v12, %v533_v13 }
 0x393   :  { %v976_v15 = vpop.f32.mrf.mxu1 }
 0x394   :  { %v539_v16 = vmax.f32 %v534_v14, 0.0 }
 0x395   :  { %v536_v17 = vpop.f32.mrf.mxu1 }
 0x396   :  { %v558_v18 = vpack.c.bf16 %v539_v16, %v539_v16 }
 0x397   :  { %v977_v19 = vpop.f32.mrf.mxu1 }
 0x398   :  { %995 = vmatmul.mubr.bf16.vlgmr.msra.gmra.mxu0 %v558_v18 }
 0x458   :  { %v645_v23 = vpop.f32.mrf.mxu0 }
 0x459   :  { %v646_v24 = vadd.f32 %v825_v22, %v645_v23 }
 0x45a   :  { %v996_v25 = vpop.f32.mrf.mxu0 }
 0x45b   :  { %v651_v26 = vmax.f32 %v646_v24, 0.0 }
 0x45c   :  { %v648_v27 = vpop.f32.mrf.mxu0 }
 0x45d   :  { %v669_v28 = vpack.c.bf16 %v651_v26, %v651_v26 }
 0x45e   :  { %v997_v29 = vpop.f32.mrf.mxu0 }
 0x45f   :  { %1015 = vmatmul.mubr.bf16.vlgmr.msra.gmra.mxu1 %v669_v28 }
 0x51f   :  { %v758_v31 = vpop.f32.mrf.mxu1 }
 0x520   :  { %v759_v32 = vadd.f32 %v834_v30, %v758_v31 }
 0x521   :  { %v1016_v33 = vpop.f32.mrf.mxu1 }
 0x522   :  { %v843_v34 = vmul.f32 -1.442695, %v759_v32 }
 0x523   :  { %v761_v0 = vpop.f32.mrf.mxu1 }
 0x524   :  { %1080 = vpow2.f32 %v843_v34 }
 0x525   :  { %v1017_v35 = vpop.f32.mrf.mxu1 }
 0x531   :  { %v1081_v36 = vpop.eup %1080 }
 0x532   :  { %v767_v37 = vadd.f32 1.0, %v1081_v36 }
 0x534   :  { %1082 = vrcp.f32 %v767_v37 }
 0x541   :  { %v1083_v38 = vpop.eup %1082 }
 0x542   :  { %770 = vst [vmem:[#allocation11] sm:$0xff] %v1083_v38 }
 0x543   :  { %1195 = shalt.err (!%p1192_p1)
}
 0x544   :  { %780 = dma.vmem_to_hbm [thread:$0]  %s778_s22, 128, %s1353_s6, [#allocation4]  }
 0x545   :  { %1210 = dma.done.wait [#allocation4], 128  }
 0x546   :  { %1211 = vsyncadd [#allocation4], 4294967168 }
 0x547   :  { %784 = vsyncpa [#allocation3], 1 }
 0x548   :  { %785 = vsyncpa [#allocation6], 1 }
 0x549   :  { %786 = vsyncpa [#allocation9], 1 }
 0x54a   :  { %787 = vsyncpa [#allocation4], 1 }

</bundles_post_ra>
